<compile_context>
chip_gen: v6e
topology: v6e:2x2x1
jax: 0.10.0
libtpu: 0.0.40
codegen_flags: <defaults>
</compile_context>

<pallas_src>
import functools

import jax
import jax.numpy as jnp
from jax.experimental import pallas as pl
from jax.experimental.pallas import tpu as pltpu


# ----------------------------------------------------------------------------
# Hardware queries (best effort, safe fallbacks).
# ----------------------------------------------------------------------------
def _vmem_capacity_bytes():
    try:
        cap = int(pltpu.get_tpu_info().vmem_capacity_bytes)
        if cap > 0:
            return cap
    except Exception:
        pass
    return 64 << 20  # conservative (v7x per-core); never over-commits VMEM


def _num_tensorcores():
    try:
        info = pltpu.get_tpu_info()
        for name in ("num_cores", "core_count", "num_tensorcores"):
            v = getattr(info, name, None)
            if v:
                return int(v)
    except Exception:
        pass
    try:
        v = getattr(jax.devices()[0], "num_cores", None)
        if v:
            return int(v)
    except Exception:
        pass
    return 1


# ----------------------------------------------------------------------------
# Fused single-pass kernel: pooling + MLP + sigmoid + gating per batch element.
# ----------------------------------------------------------------------------
def _temporal_fused_kernel(x_ref, w1t_ref, b1_ref, w2t_ref, b2_ref, o_ref,
                           *, inv_hw):
    # x_ref / o_ref block: (1, C, HW)   -- one batch element per grid step
    # w1t: (Cr, C), b1: (Cr, 1), w2t: (C, Cr), b2: (C, 1)
    xb = x_ref[0]                                             # (C, HW), native

    # Global pooling over the spatial (lane) axis in (C, 1) sublane form.
    # max is exact in the native dtype; the sum accumulates in f32.
    mx = jnp.max(xb, axis=-1, keepdims=True).astype(jnp.float32)          # (C,1)
    av = jnp.sum(xb, axis=-1, keepdims=True, dtype=jnp.float32) * inv_hw  # (C,1)

    pools = jnp.concatenate([mx, av], axis=-1)                # (C, 2) f32

    # Shared MLP applied to both pooled vectors with one pair of MXU matmuls.
    h = jnp.dot(w1t_ref[...], pools,
                preferred_element_type=jnp.float32) + b1_ref[...]         # (Cr,2)
    h = jnp.maximum(h, 0.0)
    logits = jnp.dot(w2t_ref[...], h,
                     preferred_element_type=jnp.float32) + b2_ref[...]    # (C, 2)
    # Sum columns AFTER the per-column bias: equals mlp(max)+mlp(avg) (+2*b2).
    scale = jax.nn.sigmoid(jnp.sum(logits, axis=-1, keepdims=True))       # (C, 1)

    # Gate in the native dtype: cast the tiny (C,1) scale once, broadcast over
    # the spatial lanes (no full-block casts of x).
    o_ref[...] = x_ref[...] * scale[None, :, :].astype(o_ref.dtype)


def _temporal_fused(x3, w1, b1, w2, b2, *, vmem_cap, single_buffer=False):
    B, C, HW = x3.shape
    Cr = w1.shape[1]
    itemsize = x3.dtype.itemsize

    # Pre-transpose the small weights in the wrapper (one-time, tiny) so the
    # kernel performs only standard (out,in)@(in,cols) matmuls.
    w1t = w1.T                       # (Cr, C)
    w2t = w2.T                       # (C, Cr)
    b1c = b1.reshape(Cr, 1)
    b2c = b2.reshape(C, 1)

    weight_bytes = int(w1t.size * w1t.dtype.itemsize + w2t.size * w2t.dtype.itemsize
                       + b1c.size * b1c.dtype.itemsize + b2c.size * b2c.dtype.itemsize)

    n_buf = 1 if single_buffer else 2
    # in + out blocks (n_buf deep each) + weights; no full-block f32 temps now.
    need = 2 * n_buf * C * HW * itemsize + 2 * weight_bytes
    vmem_limit = int(min(max(32 << 20, need + (8 << 20)), vmem_cap - (4 << 20)))
    vmem_limit = max(vmem_limit, 16 << 20)

    cost = pl.CostEstimate(
        flops=int(B * (3 * C * HW + 4 * C * Cr)),
        transcendentals=int(B * C),
        bytes_accessed=int(2 * B * C * HW * itemsize + weight_bytes),
    )

    kernel = functools.partial(_temporal_fused_kernel, inv_hw=float(1.0 / HW))

    if single_buffer:
        # Halve pipelined VMEM (no inter-batch overlap) to keep the 2-HBM-pass
        # fused kernel on small-VMEM parts (v7x) for larger C*HW.
        x_spec = pl.BlockSpec((1, C, HW), lambda b: (b, 0, 0),
                              pipeline_mode=pl.Buffered(1))
        o_spec = pl.BlockSpec((1, C, HW), lambda b: (b, 0, 0),
                              pipeline_mode=pl.Buffered(1))
    else:
        x_spec = pl.BlockSpec((1, C, HW), lambda b: (b, 0, 0))
        o_spec = pl.BlockSpec((1, C, HW), lambda b: (b, 0, 0))

    return pl.pallas_call(
        kernel,
        out_shape=jax.ShapeDtypeStruct((B, C, HW), x3.dtype),
        grid_spec=pltpu.PrefetchScalarGridSpec(
            num_scalar_prefetch=0,
            grid=(B,),
            in_specs=[
                x_spec,                                          # x
                pl.BlockSpec((Cr, C), lambda b: (0, 0)),         # w1^T
                pl.BlockSpec((Cr, 1), lambda b: (0, 0)),         # b1
                pl.BlockSpec((C, Cr), lambda b: (0, 0)),         # w2^T
                pl.BlockSpec((C, 1),  lambda b: (0, 0)),         # b2
            ],
            out_specs=o_spec,
        ),
        compiler_params=pltpu.CompilerParams(
            dimension_semantics=("parallel",),
            vmem_limit_bytes=vmem_limit),
        cost_estimate=cost,
    )(x3, w1t, b1c, w2t, b2c)


# ----------------------------------------------------------------------------
# Two-pass fallback.
# Pass 1: Pallas reduction kernel -> per-(b,c) max and f32 sum (one HBM read).
# Pass 2: lane-dense streaming gate kernel in the native dtype.
# ----------------------------------------------------------------------------
def _pool_kernel(x_ref, mx_ref, sm_ref, *, hw, tile):
    j = pl.program_id(1)

    @pl.when(j == 0)
    def _():
        mx_ref[...] = jnp.full_like(mx_ref, -jnp.inf)
        sm_ref[...] = jnp.zeros_like(sm_ref)

    xb = x_ref[...]                                  # (1, C, tile), native dtype
    if hw % tile != 0:
        # Mask the ragged last tile (reads of the padded region are undefined).
        lane = jax.lax.broadcasted_iota(jnp.int32, xb.shape, 2)
        valid = (j * tile + lane) < hw
        x_for_max = jnp.where(valid, xb, jnp.asarray(-jnp.inf, dtype=xb.dtype))
        x_for_sum = jnp.where(valid, xb, jnp.asarray(0, dtype=xb.dtype))
    else:
        x_for_max = xb
        x_for_sum = xb

    tile_max = jnp.max(x_for_max, axis=-1, keepdims=True).astype(jnp.float32)
    tile_sum = jnp.sum(x_for_sum, axis=-1, keepdims=True, dtype=jnp.float32)
    mx_ref[...] = jnp.maximum(mx_ref[...], tile_max)
    sm_ref[...] = sm_ref[...] + tile_sum


def _gate_kernel(scale_ref, x_ref, o_ref):
    # scale block (1, C, 1) in the native dtype broadcasts over the lane-dense
    # spatial tile; no casts in the streaming path.
    o_ref[...] = x_ref[...] * scale_ref[...]


def _temporal_two_pass(x3, w1, b1, w2, b2, *, gate_tile=None, vmem_cap=None):
    B, C, HW = x3.shape
    itemsize = x3.dtype.itemsize
    if vmem_cap is None:
        vmem_cap = _vmem_capacity_bytes()
    big_vmem = vmem_cap >= (100 << 20)          # 128 MiB parts (v5e / v6e)

    # Tile choice (shared by pool + gate): lane-dense multiple of 128; bigger
    # budget on 128 MiB parts -> fewer grid steps / larger DMAs.
    if gate_tile is None:
        budget = (24 << 20) if big_vmem else (12 << 20)
        t = (budget // (4 * C * itemsize)) // 128 * 128
        t = max(128, min(int(t), 8192))
        gate_tile = int(t) if HW > t else int(HW)
    n_hw = pl.cdiv(HW, gate_tile)

    # ---------------- Pass 1: pooled max / sum (single HBM read of x) -------
    pool_need = 2 * C * gate_tile * itemsize
    pool_vmem = int(min(max(32 << 20, pool_need + (8 << 20)), vmem_cap - (4 << 20)))
    pool_cost = pl.CostEstimate(
        flops=int(2 * B * C * HW),
        transcendentals=0,
        bytes_accessed=int(B * C * HW * itemsize + 2 * B * C * 4),
    )
    pool_kernel = functools.partial(_pool_kernel, hw=HW, tile=gate_tile)
    mx3, sm3 = pl.pallas_call(
        pool_kernel,
        out_shape=(jax.ShapeDtypeStruct((B, C, 1), jnp.float32),
                   jax.ShapeDtypeStruct((B, C, 1), jnp.float32)),
        grid_spec=pltpu.PrefetchScalarGridSpec(
            num_scalar_prefetch=0,
            grid=(B, n_hw),
            in_specs=[pl.BlockSpec((1, C, gate_tile), lambda b, j: (b, 0, j))],
            out_specs=[pl.BlockSpec((1, C, 1), lambda b, j: (b, 0, 0)),
                       pl.BlockSpec((1, C, 1), lambda b, j: (b, 0, 0))],
        ),
        compiler_params=pltpu.CompilerParams(
            dimension_semantics=("parallel", "arbitrary"),
            vmem_limit_bytes=pool_vmem),
        cost_estimate=pool_cost,
    )(x3)

    mx = mx3[:, :, 0]
    av = sm3[:, :, 0] * (1.0 / HW)

    # Tiny MLP + sigmoid on (B, C) in plain XLA; pre-cast the scale to the
    # input dtype so the gate kernel multiplies in the native dtype.
    def mlp(v):
        return jnp.maximum(v @ w1 + b1, 0.0) @ w2 + b2

    scale3 = jax.nn.sigmoid(mlp(mx) + mlp(av)).astype(x3.dtype).reshape(B, C, 1)

    # ---------------- Pass 2: gating (streaming, lane-dense tiles) ----------
    x_bufs = 2 if big_vmem else 3   # deeper buffering hides DMA jitter on v7x
    if big_vmem:
        x_spec = pl.BlockSpec((1, C, gate_tile), lambda b, j: (b, 0, j))
    else:
        x_spec = pl.BlockSpec((1, C, gate_tile), lambda b, j: (b, 0, j),
                              pipeline_mode=pl.Buffered(3))
    gate_need = (x_bufs + 2) * C * gate_tile * itemsize
    gate_vmem = int(min(max(32 << 20, gate_need + (8 << 20)), vmem_cap - (4 << 20)))
    gate_cost = pl.CostEstimate(
        flops=int(B * C * HW),
        transcendentals=0,
        bytes_accessed=int(2 * B * C * HW * itemsize + B * C * itemsize),
    )

    return pl.pallas_call(
        _gate_kernel,
        out_shape=jax.ShapeDtypeStruct((B, C, HW), x3.dtype),
        grid_spec=pltpu.PrefetchScalarGridSpec(
            num_scalar_prefetch=0,
            grid=(B, n_hw),
            in_specs=[
                pl.BlockSpec((1, C, 1), lambda b, j: (b, 0, 0)),
                x_spec,
            ],
            out_specs=pl.BlockSpec((1, C, gate_tile), lambda b, j: (b, 0, j)),
        ),
        compiler_params=pltpu.CompilerParams(
            dimension_semantics=("parallel", "parallel"),
            vmem_limit_bytes=gate_vmem),
        cost_estimate=gate_cost,
    )(scale3, x3)


# ----------------------------------------------------------------------------
# Public wrapper.
# ----------------------------------------------------------------------------
def temporal_forward(x_nchw, w1, b1, w2, b2, *, force_two_pass=False,
                     gate_tile=None):
    """temporal-module forward. x_nchw: (B, C, H, W). Returns (B, C, H, W)."""
    B, C, H, W = x_nchw.shape
    HW = H * W
    x3 = x_nchw.reshape(B, C, HW)
    itemsize = x_nchw.dtype.itemsize

    vmem_cap = _vmem_capacity_bytes()
    block_bytes = C * HW * itemsize
    fused_budget = vmem_cap - (20 << 20)       # headroom for weights + compiler

    # On multi-TensorCore parts (v7x) a (B,)-only fused grid with B == 1 idles
    # a core; the spatially parallel two-pass path wins despite one extra pass.
    multi_core = _num_tensorcores() >= 2
    small_batch_on_multicore = multi_core and B < 2 and block_bytes > (1 << 20)

    if (force_two_pass or small_batch_on_multicore
            or 2 * block_bytes > fused_budget):
        out = _temporal_two_pass(x3, w1, b1, w2, b2,
                                 gate_tile=gate_tile, vmem_cap=vmem_cap)
    else:
        # Single-buffer the big x/out blocks when double-buffering won't fit.
        single_buffer = 4 * block_bytes > fused_budget
        out = _temporal_fused(x3, w1, b1, w2, b2,
                              vmem_cap=vmem_cap, single_buffer=single_buffer)
    return out.reshape(B, C, H, W)


def _reference(x, w1, b1, w2, b2):
    B, C, H, W = x.shape
    mx = jnp.max(x.reshape(B, C, -1), axis=-1)
    av = jnp.mean(x.reshape(B, C, -1), axis=-1)

    def mlp(v):
        return jnp.maximum(v @ w1 + b1, 0.0) @ w2 + b2

    scale = jax.nn.sigmoid(mlp(mx) + mlp(av))
    return x * scale[:, :, None, None]


if __name__ == "__main__":
    # Small shapes consistent with the module: channels=4, r=2.
    B, C, H, W = 2, 4, 16, 16
    r = 2
    Cr = C // r

    key = jax.random.PRNGKey(0)
    kx, k1, k2, k3, k4 = jax.random.split(key, 5)

    x = jax.random.normal(kx, (B, C, H, W), dtype=jnp.float32)
    # nn.Linear(C, C//r) and nn.Linear(C//r, C) weights, stored as (in, out).
    w1 = jax.random.normal(k1, (C, Cr), dtype=jnp.float32) * 0.1
    b1 = jax.random.normal(k2, (Cr,), dtype=jnp.float32) * 0.1
    w2 = jax.random.normal(k3, (Cr, C), dtype=jnp.float32) * 0.1
    b2 = jax.random.normal(k4, (C,), dtype=jnp.float32) * 0.1

    ref = _reference(x, w1, b1, w2, b2)

    # 1) Fused single-pass path (default for shapes that fit VMEM), f32.
    out_fused = jax.block_until_ready(temporal_forward(x, w1, b1, w2, b2))
    assert out_fused.shape == (B, C, H, W)
    assert jnp.allclose(out_fused, ref, atol=1e-5, rtol=1e-5)

    # 2) Fused path with bf16 activations (native-dtype gating, f32 MLP/mean).
    x16 = x.astype(jnp.bfloat16)
    ref16 = _reference(x16.astype(jnp.float32), w1, b1, w2, b2)
    out16 = jax.block_until_ready(temporal_forward(x16, w1, b1, w2, b2))
    assert out16.dtype == jnp.bfloat16
    assert jnp.allclose(out16.astype(jnp.float32), ref16, atol=6e-2, rtol=6e-2)

    # 3) Two-pass fallback, evenly divisible spatial tiles.
    out_2p = jax.block_until_ready(
        temporal_forward(x, w1, b1, w2, b2, force_two_pass=True, gate_tile=128))
    assert jnp.allclose(out_2p, ref, atol=1e-5, rtol=1e-5)

    # 4) Two-pass fallback with a ragged last tile (HW = 192, tile = 128):
    #    exercises the masked pooling reduction and masked gate stores.
    xr = jax.random.normal(kx, (B, C, 16, 12), dtype=jnp.float32)
    ref_r = _reference(xr, w1, b1, w2, b2)
    out_r = jax.block_until_ready(
        temporal_forward(xr, w1, b1, w2, b2, force_two_pass=True, gate_tile=128))
    assert jnp.allclose(out_r, ref_r, atol=1e-5, rtol=1e-5)

    # 5) Two-pass fallback with the auto-selected (full-extent) tile.
    out_r2 = jax.block_until_ready(
        temporal_forward(xr, w1, b1, w2, b2, force_two_pass=True))
    assert jnp.allclose(out_r2, ref_r, atol=1e-5, rtol=1e-5)

    print("KERNEL_OK")
</pallas_src>

<mosaic_0001>
module attributes {stable_mosaic.version = 11 : i64} {
  func.func @_temporal_fused_kernel(%arg0: i32, %arg1: memref<1x4x256xf32, #tpu.memory_space<vmem>>, %arg2: memref<2x4xf32, #tpu.memory_space<vmem>>, %arg3: memref<2x1xf32, #tpu.memory_space<vmem>>, %arg4: memref<4x2xf32, #tpu.memory_space<vmem>>, %arg5: memref<4x1xf32, #tpu.memory_space<vmem>>, %arg6: memref<1x4x256xf32, #tpu.memory_space<vmem>>) attributes {dimension_semantics = [#tpu.dimension_semantics<parallel>], iteration_bounds = array<i64: 2>, scalar_prefetch = 0 : i64, scratch_operands = 0 : i64, tpu.core_type = #tpu.core_type<tc>, window_params = [{transform_indices = @transform_0, window_bounds = array<i64: 1, 4, 256>}, {pipeline_mode = #tpu.pipeline_mode<synchronous>, transform_indices = @transform_1, window_bounds = array<i64: 2, 4>}, {pipeline_mode = #tpu.pipeline_mode<synchronous>, transform_indices = @transform_2, window_bounds = array<i64: 2, 1>}, {pipeline_mode = #tpu.pipeline_mode<synchronous>, transform_indices = @transform_3, window_bounds = array<i64: 4, 2>}, {pipeline_mode = #tpu.pipeline_mode<synchronous>, transform_indices = @transform_4, window_bounds = array<i64: 4, 1>}, {transform_indices = @transform_5, window_bounds = array<i64: 1, 4, 256>}]} {
    %c0 = arith.constant 0 : index
    %c0_0 = arith.constant 0 : index
    %c0_1 = arith.constant 0 : index
    %0 = vector.load %arg1[%c0, %c0_0, %c0_1] : memref<1x4x256xf32, #tpu.memory_space<vmem>>, vector<1x4x256xf32>
    %1 = vector.shape_cast %0 : vector<1x4x256xf32> to vector<4x256xf32>
    %cst = arith.constant dense<0xFF800000> : vector<4xf32>
    %2 = vector.multi_reduction <maximumf>, %1, %cst [1] : vector<4x256xf32> to vector<4xf32>
    %3 = vector.shape_cast %2 : vector<4xf32> to vector<4x1xf32>
    %cst_2 = arith.constant dense<0.000000e+00> : vector<4xf32>
    %4 = vector.multi_reduction <add>, %1, %cst_2 [1] : vector<4x256xf32> to vector<4xf32>
    %5 = vector.shape_cast %4 : vector<4xf32> to vector<4x1xf32>
    %cst_3 = arith.constant 3.906250e-03 : f32
    %6 = vector.broadcast %cst_3 : f32 to vector<4x1xf32>
    %7 = arith.mulf %5, %6 : vector<4x1xf32>
    %8 = tpu.concatenate %3, %7 in 1 : vector<4x1xf32>, vector<4x1xf32> -> vector<4x2xf32>
    %c0_4 = arith.constant 0 : index
    %c0_5 = arith.constant 0 : index
    %9 = vector.load %arg2[%c0_4, %c0_5] : memref<2x4xf32, #tpu.memory_space<vmem>>, vector<2x4xf32>
    %cst_6 = arith.constant dense<0.000000e+00> : vector<2x2xf32>
    %10 = tpu.matmul %9, %8, %cst_6 {dimension_numbers = #tpu.dot_dimension_numbers<[1], [0], [0], [1], [0, 0, 1, 1], [], []>} : vector<2x4xf32>, vector<4x2xf32>, vector<2x2xf32> -> vector<2x2xf32>
    %c0_7 = arith.constant 0 : index
    %c0_8 = arith.constant 0 : index
    %11 = vector.load %arg3[%c0_7, %c0_8] : memref<2x1xf32, #tpu.memory_space<vmem>>, vector<2x1xf32>
    %12 = vector.broadcast %11 : vector<2x1xf32> to vector<2x2xf32>
    %13 = arith.addf %10, %12 : vector<2x2xf32>
    %cst_9 = arith.constant 0.000000e+00 : f32
    %14 = vector.broadcast %cst_9 : f32 to vector<2x2xf32>
    %15 = arith.maximumf %13, %14 : vector<2x2xf32>
    %c0_10 = arith.constant 0 : index
    %c0_11 = arith.constant 0 : index
    %16 = vector.load %arg4[%c0_10, %c0_11] : memref<4x2xf32, #tpu.memory_space<vmem>>, vector<4x2xf32>
    %cst_12 = arith.constant dense<0.000000e+00> : vector<4x2xf32>
    %17 = tpu.matmul %16, %15, %cst_12 {dimension_numbers = #tpu.dot_dimension_numbers<[1], [0], [0], [1], [0, 0, 1, 1], [], []>} : vector<4x2xf32>, vector<2x2xf32>, vector<4x2xf32> -> vector<4x2xf32>
    %c0_13 = arith.constant 0 : index
    %c0_14 = arith.constant 0 : index
    %18 = vector.load %arg5[%c0_13, %c0_14] : memref<4x1xf32, #tpu.memory_space<vmem>>, vector<4x1xf32>
    %19 = vector.broadcast %18 : vector<4x1xf32> to vector<4x2xf32>
    %20 = arith.addf %17, %19 : vector<4x2xf32>
    %cst_15 = arith.constant dense<0.000000e+00> : vector<4xf32>
    %21 = vector.multi_reduction <add>, %20, %cst_15 [1] : vector<4x2xf32> to vector<4xf32>
    %22 = vector.shape_cast %21 : vector<4xf32> to vector<4x1xf32>
    %23 = arith.negf %22 : vector<4x1xf32>
    %24 = math.exp %23 : vector<4x1xf32>
    %cst_16 = arith.constant 1.000000e+00 : f32
    %25 = vector.broadcast %cst_16 : f32 to vector<4x1xf32>
    %26 = arith.addf %25, %24 : vector<4x1xf32>
    %27 = arith.divf %25, %26 : vector<4x1xf32>
    %c0_17 = arith.constant 0 : index
    %c0_18 = arith.constant 0 : index
    %c0_19 = arith.constant 0 : index
    %28 = vector.load %arg1[%c0_17, %c0_18, %c0_19] : memref<1x4x256xf32, #tpu.memory_space<vmem>>, vector<1x4x256xf32>
    %29 = vector.shape_cast %27 : vector<4x1xf32> to vector<1x4x1xf32>
    %30 = vector.broadcast %29 : vector<1x4x1xf32> to vector<1x4x256xf32>
    %31 = arith.mulf %28, %30 : vector<1x4x256xf32>
    %c0_20 = arith.constant 0 : index
    %c0_21 = arith.constant 0 : index
    %c0_22 = arith.constant 0 : index
    %32 = vector.load %arg6[%c0_20, %c0_21, %c0_22] : memref<1x4x256xf32, #tpu.memory_space<vmem>>, vector<1x4x256xf32>
    tpu.vector_store %arg6[%c0_20, %c0_21, %c0_22], %31 {strides = array<i32>} : memref<1x4x256xf32, #tpu.memory_space<vmem>>, vector<1x4x256xf32>,
    return
  }
  func.func @transform_0(%arg0: i32) -> (i32, i32, i32) {
    %c0_i32 = arith.constant 0 : i32
    %c0_i32_0 = arith.constant 0 : i32
    %c0_i32_1 = arith.constant 0 : i32
    return %arg0, %c0_i32, %c0_i32_0 : i32, i32, i32
  }
  func.func @transform_1(%arg0: i32) -> (i32, i32) {
    %c0_i32 = arith.constant 0 : i32
    %c0_i32_0 = arith.constant 0 : i32
    %c0_i32_1 = arith.constant 0 : i32
    return %c0_i32, %c0_i32_0 : i32, i32
  }
  func.func @transform_2(%arg0: i32) -> (i32, i32) {
    %c0_i32 = arith.constant 0 : i32
    %c0_i32_0 = arith.constant 0 : i32
    %c0_i32_1 = arith.constant 0 : i32
    return %c0_i32, %c0_i32_0 : i32, i32
  }
  func.func @transform_3(%arg0: i32) -> (i32, i32) {
    %c0_i32 = arith.constant 0 : i32
    %c0_i32_0 = arith.constant 0 : i32
    %c0_i32_1 = arith.constant 0 : i32
    return %c0_i32, %c0_i32_0 : i32, i32
  }
  func.func @transform_4(%arg0: i32) -> (i32, i32) {
    %c0_i32 = arith.constant 0 : i32
    %c0_i32_0 = arith.constant 0 : i32
    %c0_i32_1 = arith.constant 0 : i32
    return %c0_i32, %c0_i32_0 : i32, i32
  }
  func.func @transform_5(%arg0: i32) -> (i32, i32, i32) {
    %c0_i32 = arith.constant 0 : i32
    %c0_i32_0 = arith.constant 0 : i32
    %c0_i32_1 = arith.constant 0 : i32
    return %arg0, %c0_i32, %c0_i32_0 : i32, i32, i32
  }
}

</mosaic_0001>

<bundles_post_ra>
// kernel: tpu_custom_call.1
= control target key start
LH: loop header
LB: loop body
LE: loop exit
PB: predicated region body
PF: predicated region fallthrough
CT: control target
= control target key end

     0   :  { %10 = vsyncpa [#allocation3], 0  ;;  %s926_s0 = inlined_call_operand.hbm [shape: f32[2,4,256], index: 0, kind: input, shape index: {}]   ;;  %s927_s1 = inlined_call_operand.vmem [shape: f32[2,4], index: 1, kind: input, shape index: {}]   ;;  %s928_s2 = inlined_call_operand.vmem [shape: f32[2,1], index: 2, kind: input, shape index: {}]   ;;  %s929_s3 = inlined_call_operand.vmem [shape: f32[4,2], index: 3, kind: input, shape index: {}]   ;;  %s930_s4 = inlined_call_operand.vmem [shape: f32[4,1], index: 4, kind: input, shape index: {}]   ;;  %s931_s5 = inlined_call_operand.hbm [shape: f32[2,4,256], index: 5, kind: output, shape index: {}]  }
   0x1   :  { %12 = vsyncpa [#allocation3 + $0x1], 0 }
   0x2   :  { %13 = vsyncpa [#allocation4], 0 }
   0x3   :  { %15 = vsyncpa [#allocation4 + $0x1], 0  ;;  %s757_s18 = smov 0   ;;  %s759_s19 = smov 0  }
   0x4   :  { %s761_s20 = smov 0   ;;  %s763_s21 = smov 0  }
   0x5 LB: > { %s778_s22 = sadd.s32 4294967295, %s719_s21   ;;  %s535_s23 = sadd.s32 4294967294, %s719_s21   ;;  %s719_s21 = sphi %s763_s21, %s948_s21   ;;  %s715_s20 = sphi %s761_s20, %s947_s20   ;;  %s711_s19 = sphi %s759_s19, %s946_s19   ;;  %s707_s18 = sphi %s757_s18, %s945_s18  }
   0x6   : > { %s782_s24 = sadd.s32 1, %s719_s21   ;;  %s28_s25 = sadd.s32 1, %s715_s20 }
   0x7   : > { %s25_s26 = ssub.s32 %s719_s21, %s782_s24  ;;  %p35_p0 = scmp.ne.s32.totalorder %s715_s20, %s711_s19 }
   0x8   : > { %p26_p1 = scmp.eq.s32.totalorder %s25_s26, 0  ;;  %p36_p2 = scmp.eq.s32.totalorder %s719_s21, 0 }
   0x9   : > { %p41_p3 = scmp.ne.s32.totalorder %s711_s19, %s707_s18  ;;  %p42_p4 = scmp.eq.s32.totalorder %s778_s22, 0 }
   0xa   : > { %s794_s27 = scalar_select %p26_p1, %s715_s20, %s28_s25  }
   0xb   : > { %p796_p5 = por %p36_p2, %p35_p0  ;;  %p800_p6 = por %p42_p4, %p41_p3 }
   0xc   : > { %p149_p7 = scmp.eq.s32.totalorder %s778_s22, 1  ;;  %p155_p8 = scmp.eq.s32.totalorder %s535_s23, 1 }
   0xd   : > { %s935_s29 = scalar_select %p800_p6, 1, 0 }
   0xe   : > { %p582_p10 = scmp.lt.s32.totalorder %s719_s21, 2  ;;  %p807_p11 = por %p149_p7, %p35_p0 }
   0xf   : > { %p811_p12 = por %p155_p8, %p41_p3  ;;  %s187_s7 = sand.u32 1, %s715_s20  }
  0x10   : > { %s936_s30 = scalar_select %p807_p11, 1, 0 }
  0x11   : > { %s937_s6 = scalar_select %p811_p12, 1, 0 }
  0x12   : > { %s554_s8 = sshll.u32 %s719_s21, 7  ;;  %s538_s9 = sshll.u32 %s187_s7, 3 }
  0x13   : > { %s820_s12 = scalar_lea.hbm %s926_s0, %s554_s8  ;;  %s191_s13 = scalar_lea.vmem [#allocation2], %s538_s9 }
  0x14   : > { %s199_s14 = sshll.u32 %s191_s13, 4  ;;  %p824_p13 = pnand %p582_p10, %p796_p5  ;;  %s828_s14 = int_to_ptr.vmem [resolvable:$true] %s199_s14 }
  0x15   : > { %s188_s16 = scalar_lea.sflag [#allocation3], %s187_s7  ;;  %s627_s17 = scalar_lea.hbm %s820_s12, 128 }
  0x16   : > { %p628_p2 = scmp.ne.s32.totalorder %s820_s12, %s627_s17  ;;  %p629_p3 = pneg %p824_p13 }
  0x17   : > { %s632_s26 = scalar_lea.hbm %s926_s0, 256  ;;  %p633_p5 = scmp.lt.s32.totalorder %s820_s12, %s926_s0 }
  0x18   : > { %p630_p4 = pnand %p629_p3, %p628_p2  ;;  %p634_p8 = scmp.lt.s32.totalorder %s632_s26, %s627_s17 }
  0x1a   : > { %p631_p7 = pneg %p630_p4  ;;  %p635_p10 = por %p634_p8, %p633_p5 }
  0x1c   : > { %p636_p9 = pnand %p635_p10, %p631_p7 }
  0x1e   : > { %639 = shalt.err (!%p636_p9)
}
  0x1f   : > { %s640_s7 = scalar_lea.vmem %s828_s14, 128  ;;  %s721_s9 = smov [#allocation2]  }
  0x20   : > { %p641_p0 = scmp.ne.s32.totalorder %s828_s14, %s640_s7  ;;  %s645_s10 = sshll.u32 %s721_s9, 4  ;;  %s646_s10 = int_to_ptr.vmem [resolvable:$false] %s645_s10 }
  0x21   : > { %s647_s11 = scalar_lea.vmem %s646_s10, 256  ;;  %p648_p4 = scmp.lt.s32.totalorder %s828_s14, %s646_s10 }
  0x22   : > { %p643_p1 = pnand %p641_p0, %p629_p3  ;;  %p649_p12 = scmp.lt.s32.totalorder %s647_s11, %s640_s7 }
  0x24   : > { %p644_p2 = pneg %p643_p1  ;;  %p650_p11 = por %p649_p12, %p648_p4 }
  0x26   : > { %p651_p6 = pnand %p650_p11, %p644_p2 }
  0x28   : > { %654 = shalt.err (!%p651_p6)
}
  0x29   : > { %577 = dma.hbm_to_vmem [thread:$0]  (!%p824_p13), %s820_s12, 128, %s828_s14, %s188_s16  }
  0x2a   : > { %p939_p9 = scmp.lt.s32.totalorder %s719_s21, 3  ;;  %p940_p7 = scmp.ge.s32.totalorder %s719_s21, 1 }
  0x2c   : > { %p205_p0 = pnand %p940_p7, %p939_p9 }
  0x2d   : > { %s855_s13 = sand.u32 (!%p205_p0), 1, %s711_s19   ;;  %p941_p6 = scmp.ne.s32.totalorder (!%p205_p0), %s935_s29, 0 }
  0x2e   : > { %208 = sbr.rel (%p205_p0) target bundleno = 783 (0x30f), region = 40  ;;  %s542_s17 = sshll.u32 (!%p205_p0), %s855_s13, 3 }
  0x2f   : > { %s211_s23 = scalar_lea.sflag (!%p205_p0), [#allocation3], %s855_s13  ;;  %s214_s15 = scalar_lea.vmem (!%p205_p0), [#allocation2], %s542_s17 }
  0x33   : > { %698 = dma.done.wait (%p941_p6), %s211_s23, 128  }
  0x34   : > { %700 = vsyncadd (%p941_p6), %s211_s23, 4294967168  ;;  %vm245_vm0 = vcmask 1043456   ;;  %v865_v0 = vld [vmem:[%s214_s15] sm:$0xff]  ;;  %v722_v8 = vmov 0.0   ;;  %vm723_vm1 = vmmov 0   ;;  %v724_v10 = vmov 0  }
  0x35   : > { %v243_v1 = vcombine.high %v865_v0, %v865_v0  ;;  %v251_v2 = vsel %vm245_vm0, %v865_v0, 0.0  ;;  %v246_v4 = vsel %vm245_vm0, %v865_v0, -inf  ;;  %560 = vmatprep.subr.mxu0 %v722_v8  ;;  %565 = vmatprep.subr.mxu1 %v722_v8  ;;  %v260_v9 = vld [vmem:[%s928_s2] sm:$0x3]  ;;  %vm257_vm2 = vcmask 7168   ;;  %s555_s7 = sshll.u32 %s778_s22, 7 }
  0x36   : > { %562 = vmatprep.mubr.msk.f32.mxu0 %vm723_vm1, %v722_v8  ;;  %567 = vmatprep.mubr.msk.f32.mxu1 %vm723_vm1, %v722_v8  ;;  %v345_v11 = vld [vmem:[%s930_s4] sm:$0xf]  ;;  %vm266_vm3 = vcmask 31744   ;;  %vm355_vm4 = vcmask 1041408   ;;  %vm351_vm5 = vcmask 15360   ;;  %vm429_vm6 = vcmask 11264   ;;  %s463_s15 = scalar_lea.hbm %s931_s5, %s555_s7 }
  0x37   : > { %v252_v3 = vsel %vm245_vm0, %v243_v1, 0.0  ;;  %v247_v5 = vsel %vm245_vm0, %v243_v1, -inf  ;;  %620 = vset.pattern.permute.xlu1 %v724_v10  ;;  %621 = vset.pattern.permute.xlu0 %v724_v10  ;;  %v259_v15 = vld [vmem:[%s927_s1] sm:$0x3]  ;;  %v725_v32 = vmov 839922192   ;;  %v443_v34 = vlaneseq }
  0x38   : > { %v253_v6 = vadd.f32 %v252_v3, %v251_v2  ;;  %v248_v7 = vmax.f32 %v246_v4, %v247_v5  ;;  %263 = vperm.xlu1 %620, %v260_v9   ;;  %v344_v22 = vld [vmem:[%s929_s3] sm:$0xf]  ;;  %v441_v33 = vunpack.c.l.s4 %v725_v32  ;;  %s240_s9 = scalar_lea.vmem [#allocation5], %s542_s17  ;;  %s451_s29 = scalar_lea.sflag [#allocation4], %s855_s13 }
  0x39   : > { %v444_v36 = vshrl.u32 %v443_v34, 7  ;;  %s465_s10 = sshll.u32 %s240_s9, 4  ;;  %p942_p12 = scmp.ne.s32.totalorder %s936_s30, 0  ;;  %s466_s10 = int_to_ptr.vmem [resolvable:$true] %s465_s10 }
  0x3a   : > { %254 = vadd.xlane.f32.xlu0 %v253_v6  ;;  %v442_v35 = vunpack.c.0.s8 %v441_v33  ;;  %s655_s12 = scalar_lea.vmem %s466_s10, 128  ;;  %s726_s14 = smov [#allocation5]  }
  0x3b   : > { %p656_p11 = scmp.ne.s32.totalorder %s466_s10, %s655_s12  ;;  %s659_s22 = sshll.u32 %s726_s14, 4  ;;  %s660_s22 = int_to_ptr.vmem [resolvable:$false] %s659_s22 }
  0x3c   : > { %348 = vperm.xlu1 %620, %v345_v11   ;;  %v445_v37 = vsub.s32 %v442_v35, %v444_v36  ;;  %s661_s17 = scalar_lea.vmem %s660_s22, 256  ;;  %p662_p3 = scmp.lt.s32.totalorder %s466_s10, %s660_s22 }
  0x3d   : > { %p657_p13 = pnand %p656_p11, %p942_p12  ;;  %p663_p5 = scmp.lt.s32.totalorder %s661_s17, %s655_s12 }
  0x3e   : > { %249 = vmax.xlane.f32.xlu0 %v248_v7 }
  0x3f   : > { %p658_p1 = pneg %p657_p13  ;;  %p664_p8 = por %p663_p5, %p662_p3 }
  0x41   : > { %p665_p10 = pnand %p664_p8, %p658_p1 }
  0xb3   : > { %v264_v17 = vpop.permute.xlu1 %263 }
  0xb7   : > { %v349_v23 = vpop.permute.xlu1 %348 }
  0xc3   : > { %v255_v12 = vpop.xlane.xlu0 %254 }
  0xc4   : > { %v256_v13 = vmul.f32 0.00390625, %v255_v12 }
  0xc7   : > { %v250_v14 = vpop.xlane.xlu0 %249 }
  0xc8   : > { %v258_v16 = vsel %vm257_vm2, %v250_v14, %v256_v13 }
  0xc9   : > { %561 = vmatpush3.msk.msra.mxu0 %vm245_vm0, %v258_v16 }
  0xca   : > { %563 = vmatmul.mubr.msk.f32.vlgmr.msra.gmra.mxu0 %vm266_vm3, %v259_v15 }
 0x18a   : > { %v339_v18 = vpop.f32.mrf.mxu0 }
 0x18b   : > { %v340_v19 = vadd.f32 %v339_v18, %v264_v17 }
 0x18c   : > { %v564_v20 = vpop.f32.mrf.mxu0 }
 0x18d   : > { %v343_v21 = vmax.f32 %v340_v19, 0.0 }
 0x18f   : > { %566 = vmatpush3.msk.msra.mxu1 %vm355_vm4, %v343_v21 }
 0x190   : > { %568 = vmatmul.mubr.msk.f32.vlgmr.msra.gmra.mxu1 %vm351_vm5, %v344_v22 }
 0x250   : > { %v425_v24 = vpop.f32.mrf.mxu1 }
 0x251   : > { %v426_v25 = vadd.f32 %v425_v24, %v349_v23 }
 0x252   : > { %v569_v26 = vpop.f32.mrf.mxu1 }
 0x253   : > { %v430_v27 = vsel %vm429_vm6, %v426_v25, 0.0 }
 0x254   : > { %431 = vadd.xlane.f32.xlu0 %v430_v27 }
 0x2dd   : > { %v432_v28 = vpop.xlane.xlu0 %431 }
 0x2de   : > { %v548_v29 = vmul.f32 -1.442695, %v432_v28 }
 0x2e0   : > { %623 = vpow2.f32 %v548_v29 }
 0x2ed   : > { %v624_v30 = vpop.eup %623 }
 0x2ee   : > { %v436_v31 = vadd.f32 1.0, %v624_v30 }
 0x2f0   : > { %625 = vrcp.f32 %v436_v31 }
 0x2fd   : > { %v626_v38 = vpop.eup %625 }
 0x2fe   : > { %v446_v39 = vrot.slane %v626_v38, %v445_v37 }
 0x300   : > { %v448_v40 = vmul.f32 %v446_v39, %v865_v0 }
 0x302   : > { %449 = vst [vmem:[%s240_s9] sm:$0xff] %v448_v40 }
 0x303   : > { %668 = shalt.err (!%p665_p10)
}
 0x304   : > { %s669_s16 = scalar_lea.hbm %s463_s15, 128  ;;  %s673_s26 = scalar_lea.hbm %s931_s5, 256 }
 0x305   : > { %p670_p2 = scmp.ne.s32.totalorder %s463_s15, %s669_s16  ;;  %p674_p7 = scmp.lt.s32.totalorder %s463_s15, %s931_s5 }
 0x306   : > { %p675_p0 = scmp.lt.s32.totalorder %s673_s26, %s669_s16 }
 0x307   : > { %p671_p4 = pnand %p670_p2, %p942_p12 }
 0x308   : > { %p676_p6 = por %p675_p0, %p674_p7 }
 0x309   : > { %p672_p9 = pneg %p671_p4 }
 0x30b   : > { %p677_p11 = pnand %p676_p6, %p672_p9 }
 0x30d   : > { %680 = shalt.err (!%p677_p11)
}
 0x30e   : > { %572 = dma.vmem_to_hbm [thread:$0]  (%p942_p12), %s466_s10, 128, %s463_s15, %s451_s29  }
 0x30f PF: > { %s477_s7 = sand.u32 1, %s707_s18   ;;  %p943_p13 = scmp.ne.s32.totalorder %s937_s6, 0 }
 0x310   : > { %p944_p1 = scmp.ge.s32.totalorder %s719_s21, 2  ;;  %s478_s9 = scalar_lea.sflag [#allocation4], %s477_s7 }
 0x312   : > { %p579_p3 = pnand %p944_p1, %p943_p13 }
 0x314   : > { %p580_p5 = pneg %p579_p3 }
 0x316   : > { %702 = dma.done.wait (%p580_p5), %s478_s9, 128  }
 0x317   : > { %704 = vsyncadd (%p580_p5), %s478_s9, 4294967168  ;;  %p18_p8 = scmp.ge.s32.totalorder %s782_s24, 4   ;;  %s945_s18 = smov %s711_s19 }
 0x318   : > { %s946_s19 = smov %s715_s20  ;;  %s947_s20 = smov %s794_s27 }
 0x319   : > { %s948_s21 = smov %s782_s24  ;;  %20 = sbr.rel (!%p18_p8) target bundleno = 5 (0x5), region = 85 }
 0x31e   :  { %483 = vsyncpa [#allocation3], 1 }
 0x31f   :  { %485 = vsyncpa [#allocation3 + $0x1], 1 }
 0x320   :  { %486 = vsyncpa [#allocation4], 1 }
 0x321   :  { %488 = vsyncpa [#allocation4 + $0x1], 1 }

</bundles_post_ra>
